<compile_context>
chip_gen: v7x
topology: tpu7x:2x2x1
jax: 0.10.0
libtpu: 0.0.40
codegen_flags: <defaults>
</compile_context>

<pallas_src>
import jax
import jax.numpy as jnp
from jax.experimental import pallas as pl
from jax.experimental.pallas import tpu as pltpu


def _copy_kernel(x_ref, o_ref):
    # Identity copy of one (tile_rows, W) VMEM tile.
    o_ref[...] = x_ref[...]


_LANE_WIDTHS = (4096, 2048, 1024, 512, 256, 128)  # wide, multiple-of-128 last dims
_TILE_BYTES_TARGET = 2 << 20                       # ~2 MiB per pipeline buffer


def _tiled_copy(slab, tile_rows):
    rows, width = slab.shape
    grid = (pl.cdiv(rows, tile_rows),)
    return pl.pallas_call(
        _copy_kernel,
        out_shape=jax.ShapeDtypeStruct((rows, width), slab.dtype),
        grid=grid,
        in_specs=[pl.BlockSpec((tile_rows, width), lambda i: (i, 0))],
        out_specs=pl.BlockSpec((tile_rows, width), lambda i: (i, 0)),
        compiler_params=pltpu.CompilerParams(
            dimension_semantics=("parallel",)
        ),
    )(slab)


def reshape_pallas(x, shape):
    """Equivalent of torch.reshape(x, shape) with the copy done in Pallas."""
    total = x.size

    # Resolve a single -1 in the target shape (torch.reshape semantics).
    shape = tuple(int(d) for d in shape)
    if any(d == -1 for d in shape):
        known = 1
        for d in shape:
            if d != -1:
                known *= d
        assert known > 0 and total % known == 0, (total, shape)
        shape = tuple(total // known if d == -1 else d for d in shape)
    prod = 1
    for d in shape:
        prod *= d
    assert prod == total, (prod, total, shape)

    # Row-major flatten of a contiguous array: free metadata op in XLA.
    flat = jnp.ravel(x)

    # Pick the widest lane dimension that divides the element count so the
    # 2-D slab view is also a free metadata op (no pad, no tail slice).
    width = None
    for w in _LANE_WIDTHS:
        if total % w == 0:
            width = w
            break

    if width is None:
        # TODO(synk): element counts not divisible by 128 fall back to a single
        # whole-array VMEM block (no tiling possible without a pad copy).
        slab = flat.reshape(1, total)
        out = pl.pallas_call(
            _copy_kernel,
            out_shape=jax.ShapeDtypeStruct((1, total), x.dtype),
        )(slab)
        return out.reshape(shape)

    rows = total // width
    itemsize = jnp.dtype(x.dtype).itemsize
    # ~2 MiB per tile; multiple of 32 rows keeps sublane packing aligned for
    # f32 / bf16 / int8 alike.
    rows_per_tile = _TILE_BYTES_TARGET // (width * itemsize)
    tile_rows = max(32, (rows_per_tile // 32) * 32)
    if tile_rows >= rows:
        tile_rows = rows  # single block covering the full row dim is legal

    slab = flat.reshape(rows, width)          # free metadata reshape
    out_slab = _tiled_copy(slab, tile_rows)
    return out_slab.reshape(shape)            # free metadata reshape


class Reshape:
    """Mirror of the PyTorch module (no parameters)."""

    def __init__(self, shape):
        self.shape = shape

    def __call__(self, x):
        return reshape_pallas(x, self.shape)


if __name__ == "__main__":
    key = jax.random.PRNGKey(0)

    # Small example consistent with the module: NCHW input reshaped to
    # (batch, channels, length) as WaveGAN does after its dense layer.
    x = jax.random.normal(key, (2, 4, 16, 16), dtype=jnp.float32)
    target_shape = (2, 4, 256)

    mod = Reshape(target_shape)
    y = mod(x)
    y = jax.block_until_ready(y)

    ref = jnp.reshape(x, target_shape)
    assert y.shape == target_shape, (y.shape, target_shape)
    assert y.dtype == x.dtype
    assert bool(jnp.array_equal(y, ref))

    # Second check: exercises the multi-block tiled path (grid > 1 with
    # 2 MiB tiles: 4 MiB of f32 -> width 4096, rows 256, tile_rows 128).
    x2 = jax.random.normal(key, (2, 64, 128, 64), dtype=jnp.float32)
    y2 = jax.block_until_ready(Reshape((2, 64, -1))(x2))
    assert bool(jnp.array_equal(y2, jnp.reshape(x2, (2, 64, 8192))))

    # Third check: odd element count -> single whole-array block fallback.
    x3 = jax.random.normal(key, (3, 5, 7), dtype=jnp.float32)
    y3 = jax.block_until_ready(Reshape((5, 21))(x3))
    assert bool(jnp.array_equal(y3, jnp.reshape(x3, (5, 21))))

    print("KERNEL_OK")
</pallas_src>

<mosaic_0001>
module attributes {stable_mosaic.version = 11 : i64} {
  func.func @_copy_kernel(%arg0: i32, %arg1: memref<1x2048xf32, #tpu.memory_space<vmem>>, %arg2: memref<1x2048xf32, #tpu.memory_space<vmem>>) attributes {dimension_semantics = [#tpu.dimension_semantics<parallel>], iteration_bounds = array<i64: 1>, scalar_prefetch = 0 : i64, scratch_operands = 0 : i64, tpu.core_type = #tpu.core_type<tc>, window_params = [{transform_indices = @transform_0, window_bounds = array<i64: 1, 2048>}, {transform_indices = @transform_1, window_bounds = array<i64: 1, 2048>}]} {
    %c0 = arith.constant 0 : index
    %c0_0 = arith.constant 0 : index
    %0 = vector.load %arg1[%c0, %c0_0] : memref<1x2048xf32, #tpu.memory_space<vmem>>, vector<1x2048xf32>
    %c0_1 = arith.constant 0 : index
    %c0_2 = arith.constant 0 : index
    %1 = vector.load %arg2[%c0_1, %c0_2] : memref<1x2048xf32, #tpu.memory_space<vmem>>, vector<1x2048xf32>
    tpu.vector_store %arg2[%c0_1, %c0_2], %0 {strides = array<i32>} : memref<1x2048xf32, #tpu.memory_space<vmem>>, vector<1x2048xf32>,
    return
  }
  func.func @transform_0(%arg0: i32) -> (i32, i32) {
    %c0_i32 = arith.constant 0 : i32
    %c0_i32_0 = arith.constant 0 : i32
    return %arg0, %c0_i32 : i32, i32
  }
  func.func @transform_1(%arg0: i32) -> (i32, i32) {
    %c0_i32 = arith.constant 0 : i32
    %c0_i32_0 = arith.constant 0 : i32
    return %arg0, %c0_i32 : i32, i32
  }
}

</mosaic_0001>

<bundles_post_ra>
// kernel: tpu_custom_call.1
= control target key start
LH: loop header
LB: loop body
LE: loop exit
PB: predicated region body
PF: predicated region fallthrough
CT: control target
= control target key end

     0   :  { %6 = vsyncpa [#allocation3], 0  ;;  %s126_s0 = inlined_call_operand.hbm [shape: f32[1,2048], index: 0, kind: input, shape index: {}]   ;;  %s127_s1 = inlined_call_operand.hbm [shape: f32[1,2048], index: 1, kind: output, shape index: {}]  }
   0x1   :  { %7 = vsyncpa [#allocation4], 0  ;;  %s90_s6 = smov [#allocation2]   ;;  %s42_s10 = scalar_lea.hbm %s126_s0, 256 }
   0x2   :  { %s14_s7 = sshll.u32 %s90_s6, 4  ;;  %p43_p0 = scmp.ne.s32.totalorder %s126_s0, %s42_s10  ;;  %s15_s7 = int_to_ptr.vmem [resolvable:$true] %s14_s7 }
   0x3   :  { %p46_p1 = scmp.lt.u32.totalorder %s42_s10, %s126_s0 }
   0x5   :  { %p48_p2 = pnand %p46_p1, %p43_p0 }
   0x7   :  { %51 = shalt.err (!%p48_p2)
}
   0x8   :  { %s52_s15 = scalar_lea.vmem %s15_s7, 256  ;;  %p57_p4 = scmp.lt.s32.totalorder %s15_s7, %s15_s7 }
   0x9   :  { %p53_p3 = scmp.ne.s32.totalorder %s15_s7, %s52_s15  ;;  %p58_p5 = scmp.lt.s32.totalorder %s52_s15, %s52_s15 }
   0xb   :  { %p59_p6 = por %p58_p5, %p57_p4 }
   0xd   :  { %p60_p7 = pnand %p59_p6, %p53_p3 }
   0xf   :  { %63 = shalt.err (!%p60_p7)
}
  0x10   :  { %17 = dma.hbm_to_vmem [thread:$0]  %s126_s0, 256, %s15_s7, [#allocation3]  }
  0x11   :  { %86 = dma.done.wait [#allocation3], 256  }
  0x12   :  { %87 = vsyncadd [#allocation3], 4294967040  ;;  %s91_s18 = smov [#allocation5]   ;;  %v21_v0 = vld [vmem:[#allocation2] sm:$0xff]  ;;  %v22_v1 = vld [vmem:[#allocation2 + $0x8] sm:$0xff] }
  0x13   :  { %s31_s19 = sshll.u32 %s91_s18, 4  ;;  %23 = vst [vmem:[#allocation5] sm:$0xff] %v21_v0  ;;  %24 = vst [vmem:[#allocation5 + $0x8] sm:$0xff] %v22_v1  ;;  %s32_s19 = int_to_ptr.vmem [resolvable:$true] %s31_s19 }
  0x14   :  { %s64_s20 = scalar_lea.vmem %s32_s19, 256  ;;  %p69_p9 = scmp.lt.s32.totalorder %s32_s19, %s32_s19 }
  0x15   :  { %p65_p8 = scmp.ne.s32.totalorder %s32_s19, %s64_s20  ;;  %p70_p10 = scmp.lt.s32.totalorder %s64_s20, %s64_s20 }
  0x17   :  { %p71_p11 = por %p70_p10, %p69_p9 }
  0x19   :  { %p72_p12 = pnand %p71_p11, %p65_p8 }
  0x1b   :  { %75 = shalt.err (!%p72_p12)
}
  0x1c   :  { %s76_s0 = scalar_lea.hbm %s127_s1, 256 }
  0x1d   :  { %p77_p13 = scmp.ne.s32.totalorder %s127_s1, %s76_s0  ;;  %p80_p0 = scmp.lt.u32.totalorder %s76_s0, %s127_s1 }
  0x1f   :  { %p82_p1 = pnand %p80_p0, %p77_p13 }
  0x21   :  { %85 = shalt.err (!%p82_p1)
}
  0x22   :  { %34 = dma.vmem_to_hbm [thread:$0]  %s32_s19, 256, %s127_s1, [#allocation4]  }
  0x23   :  { %88 = dma.done.wait [#allocation4], 256  }
  0x24   :  { %89 = vsyncadd [#allocation4], 4294967040 }
  0x25   :  { %38 = vsyncpa [#allocation3], 1 }
  0x26   :  { %39 = vsyncpa [#allocation4], 1 }

</bundles_post_ra>
